<compile_context>
chip_gen: v6e
topology: v6e:2x2x1
jax: 0.10.0
libtpu: 0.0.40
codegen_flags: <defaults>
</compile_context>

<pallas_src>
import functools

import jax
import jax.numpy as jnp
from jax.experimental import pallas as pl
from jax.experimental.pallas import tpu as pltpu


def _round_up(x, m):
    return ((x + m - 1) // m) * m


def _dsconv_kernel(x_ref, dw_w_ref, dw_scale_ref, dw_shift_ref,
                   pw_w_ref, pw_scale_ref, pw_shift_ref, out_ref, y_ref,
                   *, K, Wp, L_valid):
    """One batch image per grid step; all spatial positions lane-dense.

    x_ref          : (1, C_pad, L_in)     VMEM  zero-padded, row-major flattened input
    dw_w_ref       : (K*K, C_pad, 1)      VMEM  depthwise taps (tap-major)
    dw_scale/shift : (C_pad, 1)           VMEM  folded BN (depthwise branch)
    pw_w_ref       : (Co_pad, C_pad)      VMEM  pointwise 1x1 weights
    pw_scale/shift : (Co_pad, 1)          VMEM  folded BN (pointwise branch)
    out_ref        : (1, Co_pad, L_valid) VMEM  lane-dense output slab
    y_ref          : (C_pad, L_valid)     VMEM  scratch: depthwise activations
    """
    xf = x_ref[0].astype(jnp.float32)                       # (C_pad, L_in)
    C_pad = xf.shape[0]

    # ---- depthwise KxK conv: K*K channel-vectorized FMAs over the slab ----
    acc = jnp.zeros((C_pad, L_valid), jnp.float32)
    for kh in range(K):
        for kw in range(K):
            tap = dw_w_ref[kh * K + kw].astype(jnp.float32)  # (C_pad, 1)
            shift = kh * Wp + kw                             # static lane shift
            acc = acc + tap * xf[:, shift:shift + L_valid]

    # folded BN + ReLU (vector constants broadcast along lanes)
    y_ref[...] = jnp.maximum(
        acc * dw_scale_ref[...] + dw_shift_ref[...], 0.0)

    # ---- pointwise 1x1 conv on the MXU + folded BN (act=False: no ReLU) ----
    z = jnp.dot(pw_w_ref[...].astype(jnp.float32), y_ref[...],
                preferred_element_type=jnp.float32)          # (Co_pad, L_valid)
    z = z * pw_scale_ref[...] + pw_shift_ref[...]
    out_ref[0] = z.astype(out_ref.dtype)                     # lane-dense store


def depthwise_separable_conv(x, dw_w, dw_scale, dw_shift,
                             pw_w, pw_scale, pw_shift,
                             *, kernel_size=3, padding=1):
    """x: (N, C, H, W) float32 -> (N, Co, H_out, W_out)."""
    N, C, H, W = x.shape
    Co = pw_w.shape[0]
    K = kernel_size

    Hp, Wp = H + 2 * padding, W + 2 * padding
    H_out, W_out = Hp - K + 1, Wp - K + 1

    # Alignment padding (zeros are exact no-ops through both conv stages).
    C_pad = _round_up(C, 8)
    Co_pad = _round_up(Co, 8)
    # Output slab keeps the padded row stride Wp; round to a lane multiple.
    L_valid = _round_up(H_out * Wp, 128)
    s_max = (K - 1) * Wp + (K - 1)
    L_in = _round_up(L_valid + s_max, 128)

    # Zero-pad (conv halo + channel alignment), flatten spatial to one lane axis.
    x_pad = jnp.pad(x, ((0, 0), (0, C_pad - C),
                        (padding, padding), (padding, padding)))
    x_flat = x_pad.reshape(N, C_pad, Hp * Wp)
    x_flat = jnp.pad(x_flat, ((0, 0), (0, 0), (0, L_in - Hp * Wp)))

    # Depthwise taps, tap-major so the kernel indexes the leading dim only.
    dw_w_taps = jnp.pad(dw_w.reshape(C, K * K), ((0, C_pad - C), (0, 0)))
    dw_w_taps = jnp.transpose(dw_w_taps, (1, 0))[:, :, None]   # (K*K, C_pad, 1)
    dw_scale2 = jnp.pad(dw_scale.reshape(C, 1), ((0, C_pad - C), (0, 0)))
    dw_shift2 = jnp.pad(dw_shift.reshape(C, 1), ((0, C_pad - C), (0, 0)))
    pw_w2 = jnp.pad(pw_w, ((0, Co_pad - Co), (0, C_pad - C)))
    pw_scale2 = jnp.pad(pw_scale.reshape(Co, 1), ((0, Co_pad - Co), (0, 0)))
    pw_shift2 = jnp.pad(pw_shift.reshape(Co, 1), ((0, Co_pad - Co), (0, 0)))

    kernel = functools.partial(_dsconv_kernel, K=K, Wp=Wp, L_valid=L_valid)

    out_flat = pl.pallas_call(
        kernel,
        out_shape=jax.ShapeDtypeStruct((N, Co_pad, L_valid), x.dtype),
        grid_spec=pltpu.PrefetchScalarGridSpec(
            num_scalar_prefetch=0,
            grid=(N,),
            in_specs=[
                pl.BlockSpec((1, C_pad, L_in), lambda n: (n, 0, 0)),
                pl.BlockSpec((K * K, C_pad, 1), lambda n: (0, 0, 0)),
                pl.BlockSpec((C_pad, 1), lambda n: (0, 0)),
                pl.BlockSpec((C_pad, 1), lambda n: (0, 0)),
                pl.BlockSpec((Co_pad, C_pad), lambda n: (0, 0)),
                pl.BlockSpec((Co_pad, 1), lambda n: (0, 0)),
                pl.BlockSpec((Co_pad, 1), lambda n: (0, 0)),
            ],
            out_specs=pl.BlockSpec((1, Co_pad, L_valid), lambda n: (n, 0, 0)),
            scratch_shapes=[pltpu.VMEM((C_pad, L_valid), jnp.float32)],
        ),
        compiler_params=pltpu.CompilerParams(
            dimension_semantics=("parallel",)),
    )(x_flat, dw_w_taps, dw_scale2, dw_shift2, pw_w2, pw_scale2, pw_shift2)

    # Un-flatten: valid outputs sit at row stride Wp; drop alignment padding.
    out = out_flat[:, :Co, :H_out * Wp].reshape(N, Co, H_out, Wp)
    return out[:, :, :, :W_out]


def _fold_bn(gamma, beta, mean, var, eps=1e-5):
    scale = gamma / jnp.sqrt(var + eps)
    shift = beta - mean * scale
    return scale, shift


def _reference(x, dw_w, dw_scale, dw_shift, pw_w, pw_scale, pw_shift, K, padding):
    """Pure-JAX reference of the same forward pass."""
    N, C, H, W = x.shape
    xp = jnp.pad(x, ((0, 0), (0, 0), (padding, padding), (padding, padding)))
    Ho = H + 2 * padding - K + 1
    Wo = W + 2 * padding - K + 1
    y = jnp.zeros((N, C, Ho, Wo), jnp.float32)
    for kh in range(K):
        for kw in range(K):
            y = y + dw_w[None, :, kh, kw, None, None] * xp[:, :, kh:kh + Ho, kw:kw + Wo]
    y = jnp.maximum(y * dw_scale[None, :, None, None] + dw_shift[None, :, None, None], 0.0)
    z = jnp.einsum('oc,nchw->nohw', pw_w, y)
    return z * pw_scale[None, :, None, None] + pw_shift[None, :, None, None]


if __name__ == "__main__":
    key = jax.random.PRNGKey(0)
    ks = jax.random.split(key, 9)

    # Shapes consistent with the module: in_channels=4, out_channels=8,
    # kernel_size=3, stride=1, padding=1, groups=in_channels (depthwise),
    # bias=False, norm='BN', act=False.
    N, C, Co, H, W, K, pad = 2, 4, 8, 16, 16, 3, 1

    x = jax.random.normal(ks[0], (N, C, H, W), jnp.float32)

    # depthwise Conv2d(C, C, K, groups=C, bias=False): weight (C, 1, K, K) -> (C, K, K)
    dw_w = 0.2 * jax.random.normal(ks[1], (C, K, K), jnp.float32)
    # pointwise Conv2d(C, Co, 1, bias=False): weight (Co, C, 1, 1) -> (Co, C)
    pw_w = 0.2 * jax.random.normal(ks[2], (Co, C), jnp.float32)

    # Deterministic inference-mode BatchNorm params, folded to scale/shift.
    dw_gamma = 1.0 + 0.1 * jax.random.normal(ks[3], (C,), jnp.float32)
    dw_beta = 0.1 * jax.random.normal(ks[4], (C,), jnp.float32)
    dw_mean = 0.1 * jax.random.normal(ks[5], (C,), jnp.float32)
    dw_var = jnp.abs(jax.random.normal(ks[6], (C,), jnp.float32)) + 0.5
    pw_gamma = 1.0 + 0.1 * jax.random.normal(ks[7], (Co,), jnp.float32)
    pw_beta = 0.1 * jax.random.normal(ks[8], (Co,), jnp.float32)
    pw_mean = jnp.zeros((Co,), jnp.float32)
    pw_var = jnp.ones((Co,), jnp.float32)

    dw_scale, dw_shift = _fold_bn(dw_gamma, dw_beta, dw_mean, dw_var)
    pw_scale, pw_shift = _fold_bn(pw_gamma, pw_beta, pw_mean, pw_var)

    out = depthwise_separable_conv(x, dw_w, dw_scale, dw_shift,
                                   pw_w, pw_scale, pw_shift,
                                   kernel_size=K, padding=pad)
    out = jax.block_until_ready(out)

    ref = _reference(x, dw_w, dw_scale, dw_shift, pw_w, pw_scale, pw_shift, K, pad)
    assert out.shape == (N, Co, H, W), out.shape
    # Tolerance allows for reduced-precision f32 passes on the MXU for the
    # pointwise matmul; indexing/layout bugs would show up as O(0.1-1) errors.
    assert jnp.allclose(out, ref, rtol=1e-2, atol=1e-2), \
        float(jnp.max(jnp.abs(out - ref)))
    print("KERNEL_OK")
</pallas_src>

<mosaic_0001>
module attributes {stable_mosaic.version = 11 : i64} {
  func.func @_dsconv_kernel(%arg0: i32, %arg1: memref<1x8x512xf32, #tpu.memory_space<vmem>>, %arg2: memref<9x8x1xf32, #tpu.memory_space<vmem>>, %arg3: memref<8x1xf32, #tpu.memory_space<vmem>>, %arg4: memref<8x1xf32, #tpu.memory_space<vmem>>, %arg5: memref<8x8xf32, #tpu.memory_space<vmem>>, %arg6: memref<8x1xf32, #tpu.memory_space<vmem>>, %arg7: memref<8x1xf32, #tpu.memory_space<vmem>>, %arg8: memref<1x8x384xf32, #tpu.memory_space<vmem>>, %arg9: memref<8x384xf32, #tpu.memory_space<vmem>>) attributes {dimension_semantics = [#tpu.dimension_semantics<parallel>], iteration_bounds = array<i64: 2>, scalar_prefetch = 0 : i64, scratch_operands = 1 : i64, tpu.core_type = #tpu.core_type<tc>, window_params = [{transform_indices = @transform_0, window_bounds = array<i64: 1, 8, 512>}, {pipeline_mode = #tpu.pipeline_mode<synchronous>, transform_indices = @transform_1, window_bounds = array<i64: 9, 8, 1>}, {pipeline_mode = #tpu.pipeline_mode<synchronous>, transform_indices = @transform_2, window_bounds = array<i64: 8, 1>}, {pipeline_mode = #tpu.pipeline_mode<synchronous>, transform_indices = @transform_3, window_bounds = array<i64: 8, 1>}, {pipeline_mode = #tpu.pipeline_mode<synchronous>, transform_indices = @transform_4, window_bounds = array<i64: 8, 8>}, {pipeline_mode = #tpu.pipeline_mode<synchronous>, transform_indices = @transform_5, window_bounds = array<i64: 8, 1>}, {pipeline_mode = #tpu.pipeline_mode<synchronous>, transform_indices = @transform_6, window_bounds = array<i64: 8, 1>}, {transform_indices = @transform_7, window_bounds = array<i64: 1, 8, 384>}]} {
    %c0 = arith.constant 0 : index
    %c0_0 = arith.constant 0 : index
    %c0_1 = arith.constant 0 : index
    %0 = vector.load %arg1[%c0, %c0_0, %c0_1] : memref<1x8x512xf32, #tpu.memory_space<vmem>>, vector<1x8x512xf32>
    %1 = vector.shape_cast %0 : vector<1x8x512xf32> to vector<8x512xf32>
    %cst = arith.constant 0.000000e+00 : f32
    %2 = vector.broadcast %cst : f32 to vector<8x384xf32>
    %c0_2 = arith.constant 0 : index
    %c0_3 = arith.constant 0 : index
    %c0_4 = arith.constant 0 : index
    %3 = vector.load %arg2[%c0_2, %c0_3, %c0_4] : memref<9x8x1xf32, #tpu.memory_space<vmem>>, vector<1x8x1xf32>
    %4 = vector.shape_cast %3 : vector<1x8x1xf32> to vector<8x1xf32>
    %5 = vector.extract_strided_slice %1 {offsets = [0, 0], sizes = [8, 384], strides = [1, 1]} : vector<8x512xf32> to vector<8x384xf32>
    %6 = vector.broadcast %4 : vector<8x1xf32> to vector<8x384xf32>
    %7 = arith.mulf %6, %5 : vector<8x384xf32>
    %8 = arith.addf %2, %7 : vector<8x384xf32>
    %c1 = arith.constant 1 : index
    %c0_5 = arith.constant 0 : index
    %c0_6 = arith.constant 0 : index
    %9 = vector.load %arg2[%c1, %c0_5, %c0_6] : memref<9x8x1xf32, #tpu.memory_space<vmem>>, vector<1x8x1xf32>
    %10 = vector.shape_cast %9 : vector<1x8x1xf32> to vector<8x1xf32>
    %11 = vector.extract_strided_slice %1 {offsets = [0, 1], sizes = [8, 384], strides = [1, 1]} : vector<8x512xf32> to vector<8x384xf32>
    %12 = vector.broadcast %10 : vector<8x1xf32> to vector<8x384xf32>
    %13 = arith.mulf %12, %11 : vector<8x384xf32>
    %14 = arith.addf %8, %13 : vector<8x384xf32>
    %c2 = arith.constant 2 : index
    %c0_7 = arith.constant 0 : index
    %c0_8 = arith.constant 0 : index
    %15 = vector.load %arg2[%c2, %c0_7, %c0_8] : memref<9x8x1xf32, #tpu.memory_space<vmem>>, vector<1x8x1xf32>
    %16 = vector.shape_cast %15 : vector<1x8x1xf32> to vector<8x1xf32>
    %17 = vector.extract_strided_slice %1 {offsets = [0, 2], sizes = [8, 384], strides = [1, 1]} : vector<8x512xf32> to vector<8x384xf32>
    %18 = vector.broadcast %16 : vector<8x1xf32> to vector<8x384xf32>
    %19 = arith.mulf %18, %17 : vector<8x384xf32>
    %20 = arith.addf %14, %19 : vector<8x384xf32>
    %c3 = arith.constant 3 : index
    %c0_9 = arith.constant 0 : index
    %c0_10 = arith.constant 0 : index
    %21 = vector.load %arg2[%c3, %c0_9, %c0_10] : memref<9x8x1xf32, #tpu.memory_space<vmem>>, vector<1x8x1xf32>
    %22 = vector.shape_cast %21 : vector<1x8x1xf32> to vector<8x1xf32>
    %23 = vector.extract_strided_slice %1 {offsets = [0, 18], sizes = [8, 384], strides = [1, 1]} : vector<8x512xf32> to vector<8x384xf32>
    %24 = vector.broadcast %22 : vector<8x1xf32> to vector<8x384xf32>
    %25 = arith.mulf %24, %23 : vector<8x384xf32>
    %26 = arith.addf %20, %25 : vector<8x384xf32>
    %c4 = arith.constant 4 : index
    %c0_11 = arith.constant 0 : index
    %c0_12 = arith.constant 0 : index
    %27 = vector.load %arg2[%c4, %c0_11, %c0_12] : memref<9x8x1xf32, #tpu.memory_space<vmem>>, vector<1x8x1xf32>
    %28 = vector.shape_cast %27 : vector<1x8x1xf32> to vector<8x1xf32>
    %29 = vector.extract_strided_slice %1 {offsets = [0, 19], sizes = [8, 384], strides = [1, 1]} : vector<8x512xf32> to vector<8x384xf32>
    %30 = vector.broadcast %28 : vector<8x1xf32> to vector<8x384xf32>
    %31 = arith.mulf %30, %29 : vector<8x384xf32>
    %32 = arith.addf %26, %31 : vector<8x384xf32>
    %c5 = arith.constant 5 : index
    %c0_13 = arith.constant 0 : index
    %c0_14 = arith.constant 0 : index
    %33 = vector.load %arg2[%c5, %c0_13, %c0_14] : memref<9x8x1xf32, #tpu.memory_space<vmem>>, vector<1x8x1xf32>
    %34 = vector.shape_cast %33 : vector<1x8x1xf32> to vector<8x1xf32>
    %35 = vector.extract_strided_slice %1 {offsets = [0, 20], sizes = [8, 384], strides = [1, 1]} : vector<8x512xf32> to vector<8x384xf32>
    %36 = vector.broadcast %34 : vector<8x1xf32> to vector<8x384xf32>
    %37 = arith.mulf %36, %35 : vector<8x384xf32>
    %38 = arith.addf %32, %37 : vector<8x384xf32>
    %c6 = arith.constant 6 : index
    %c0_15 = arith.constant 0 : index
    %c0_16 = arith.constant 0 : index
    %39 = vector.load %arg2[%c6, %c0_15, %c0_16] : memref<9x8x1xf32, #tpu.memory_space<vmem>>, vector<1x8x1xf32>
    %40 = vector.shape_cast %39 : vector<1x8x1xf32> to vector<8x1xf32>
    %41 = vector.extract_strided_slice %1 {offsets = [0, 36], sizes = [8, 384], strides = [1, 1]} : vector<8x512xf32> to vector<8x384xf32>
    %42 = vector.broadcast %40 : vector<8x1xf32> to vector<8x384xf32>
    %43 = arith.mulf %42, %41 : vector<8x384xf32>
    %44 = arith.addf %38, %43 : vector<8x384xf32>
    %c7 = arith.constant 7 : index
    %c0_17 = arith.constant 0 : index
    %c0_18 = arith.constant 0 : index
    %45 = vector.load %arg2[%c7, %c0_17, %c0_18] : memref<9x8x1xf32, #tpu.memory_space<vmem>>, vector<1x8x1xf32>
    %46 = vector.shape_cast %45 : vector<1x8x1xf32> to vector<8x1xf32>
    %47 = vector.extract_strided_slice %1 {offsets = [0, 37], sizes = [8, 384], strides = [1, 1]} : vector<8x512xf32> to vector<8x384xf32>
    %48 = vector.broadcast %46 : vector<8x1xf32> to vector<8x384xf32>
    %49 = arith.mulf %48, %47 : vector<8x384xf32>
    %50 = arith.addf %44, %49 : vector<8x384xf32>
    %c8 = arith.constant 8 : index
    %c0_19 = arith.constant 0 : index
    %c0_20 = arith.constant 0 : index
    %51 = vector.load %arg2[%c8, %c0_19, %c0_20] : memref<9x8x1xf32, #tpu.memory_space<vmem>>, vector<1x8x1xf32>
    %52 = vector.shape_cast %51 : vector<1x8x1xf32> to vector<8x1xf32>
    %53 = vector.extract_strided_slice %1 {offsets = [0, 38], sizes = [8, 384], strides = [1, 1]} : vector<8x512xf32> to vector<8x384xf32>
    %54 = vector.broadcast %52 : vector<8x1xf32> to vector<8x384xf32>
    %55 = arith.mulf %54, %53 : vector<8x384xf32>
    %56 = arith.addf %50, %55 : vector<8x384xf32>
    %c0_21 = arith.constant 0 : index
    %c0_22 = arith.constant 0 : index
    %57 = vector.load %arg3[%c0_21, %c0_22] : memref<8x1xf32, #tpu.memory_space<vmem>>, vector<8x1xf32>
    %58 = vector.broadcast %57 : vector<8x1xf32> to vector<8x384xf32>
    %59 = arith.mulf %56, %58 : vector<8x384xf32>
    %c0_23 = arith.constant 0 : index
    %c0_24 = arith.constant 0 : index
    %60 = vector.load %arg4[%c0_23, %c0_24] : memref<8x1xf32, #tpu.memory_space<vmem>>, vector<8x1xf32>
    %61 = vector.broadcast %60 : vector<8x1xf32> to vector<8x384xf32>
    %62 = arith.addf %59, %61 : vector<8x384xf32>
    %cst_25 = arith.constant 0.000000e+00 : f32
    %63 = vector.broadcast %cst_25 : f32 to vector<8x384xf32>
    %64 = arith.maximumf %62, %63 : vector<8x384xf32>
    %c0_26 = arith.constant 0 : index
    %c0_27 = arith.constant 0 : index
    %65 = vector.load %arg9[%c0_26, %c0_27] : memref<8x384xf32, #tpu.memory_space<vmem>>, vector<8x384xf32>
    tpu.vector_store %arg9[%c0_26, %c0_27], %64 {strides = array<i32>} : memref<8x384xf32, #tpu.memory_space<vmem>>, vector<8x384xf32>,
    %c0_28 = arith.constant 0 : index
    %c0_29 = arith.constant 0 : index
    %66 = vector.load %arg5[%c0_28, %c0_29] : memref<8x8xf32, #tpu.memory_space<vmem>>, vector<8x8xf32>
    %c0_30 = arith.constant 0 : index
    %c0_31 = arith.constant 0 : index
    %67 = vector.load %arg9[%c0_30, %c0_31] : memref<8x384xf32, #tpu.memory_space<vmem>>, vector<8x384xf32>
    %cst_32 = arith.constant dense<0.000000e+00> : vector<8x384xf32>
    %68 = tpu.matmul %66, %67, %cst_32 {dimension_numbers = #tpu.dot_dimension_numbers<[1], [0], [0], [1], [0, 0, 1, 1], [], []>} : vector<8x8xf32>, vector<8x384xf32>, vector<8x384xf32> -> vector<8x384xf32>
    %c0_33 = arith.constant 0 : index
    %c0_34 = arith.constant 0 : index
    %69 = vector.load %arg6[%c0_33, %c0_34] : memref<8x1xf32, #tpu.memory_space<vmem>>, vector<8x1xf32>
    %70 = vector.broadcast %69 : vector<8x1xf32> to vector<8x384xf32>
    %71 = arith.mulf %68, %70 : vector<8x384xf32>
    %c0_35 = arith.constant 0 : index
    %c0_36 = arith.constant 0 : index
    %72 = vector.load %arg7[%c0_35, %c0_36] : memref<8x1xf32, #tpu.memory_space<vmem>>, vector<8x1xf32>
    %73 = vector.broadcast %72 : vector<8x1xf32> to vector<8x384xf32>
    %74 = arith.addf %71, %73 : vector<8x384xf32>
    %c0_37 = arith.constant 0 : index
    %c0_38 = arith.constant 0 : index
    %c0_39 = arith.constant 0 : index
    %75 = vector.load %arg8[%c0_37, %c0_38, %c0_39] : memref<1x8x384xf32, #tpu.memory_space<vmem>>, vector<1x8x384xf32>
    %76 = vector.shape_cast %75 : vector<1x8x384xf32> to vector<8x384xf32>
    %77 = vector.shape_cast %74 : vector<8x384xf32> to vector<1x8x384xf32>
    tpu.vector_store %arg8[%c0_37, %c0_38, %c0_39], %77 {strides = array<i32>} : memref<1x8x384xf32, #tpu.memory_space<vmem>>, vector<1x8x384xf32>,
    return
  }
  func.func @transform_0(%arg0: i32) -> (i32, i32, i32) {
    %c0_i32 = arith.constant 0 : i32
    %c0_i32_0 = arith.constant 0 : i32
    %c0_i32_1 = arith.constant 0 : i32
    return %arg0, %c0_i32, %c0_i32_0 : i32, i32, i32
  }
  func.func @transform_1(%arg0: i32) -> (i32, i32, i32) {
    %c0_i32 = arith.constant 0 : i32
    %c0_i32_0 = arith.constant 0 : i32
    %c0_i32_1 = arith.constant 0 : i32
    %c0_i32_2 = arith.constant 0 : i32
    return %c0_i32, %c0_i32_0, %c0_i32_1 : i32, i32, i32
  }
  func.func @transform_2(%arg0: i32) -> (i32, i32) {
    %c0_i32 = arith.constant 0 : i32
    %c0_i32_0 = arith.constant 0 : i32
    %c0_i32_1 = arith.constant 0 : i32
    return %c0_i32, %c0_i32_0 : i32, i32
  }
  func.func @transform_3(%arg0: i32) -> (i32, i32) {
    %c0_i32 = arith.constant 0 : i32
    %c0_i32_0 = arith.constant 0 : i32
    %c0_i32_1 = arith.constant 0 : i32
    return %c0_i32, %c0_i32_0 : i32, i32
  }
  func.func @transform_4(%arg0: i32) -> (i32, i32) {
    %c0_i32 = arith.constant 0 : i32
    %c0_i32_0 = arith.constant 0 : i32
    %c0_i32_1 = arith.constant 0 : i32
    return %c0_i32, %c0_i32_0 : i32, i32
  }
  func.func @transform_5(%arg0: i32) -> (i32, i32) {
    %c0_i32 = arith.constant 0 : i32
    %c0_i32_0 = arith.constant 0 : i32
    %c0_i32_1 = arith.constant 0 : i32
    return %c0_i32, %c0_i32_0 : i32, i32
  }
  func.func @transform_6(%arg0: i32) -> (i32, i32) {
    %c0_i32 = arith.constant 0 : i32
    %c0_i32_0 = arith.constant 0 : i32
    %c0_i32_1 = arith.constant 0 : i32
    return %c0_i32, %c0_i32_0 : i32, i32
  }
  func.func @transform_7(%arg0: i32) -> (i32, i32, i32) {
    %c0_i32 = arith.constant 0 : i32
    %c0_i32_0 = arith.constant 0 : i32
    %c0_i32_1 = arith.constant 0 : i32
    return %arg0, %c0_i32, %c0_i32_0 : i32, i32, i32
  }
}

</mosaic_0001>

<bundles_post_ra>
// kernel: tpu_custom_call.1
= control target key start
LH: loop header
LB: loop body
LE: loop exit
PB: predicated region body
PF: predicated region fallthrough
CT: control target
= control target key end

     0   :  { %12 = vsyncpa [#allocation4], 0  ;;  %s1223_s0 = inlined_call_operand.vmem [shape: f32[2,8,512], index: 0, kind: input, shape index: {}]   ;;  %s1224_s1 = inlined_call_operand.vmem [shape: f32[9,8,1], index: 1, kind: input, shape index: {}]   ;;  %s1225_s2 = inlined_call_operand.vmem [shape: f32[8,1], index: 2, kind: input, shape index: {}]   ;;  %s1226_s3 = inlined_call_operand.vmem [shape: f32[8,1], index: 3, kind: input, shape index: {}]   ;;  %s1227_s4 = inlined_call_operand.vmem [shape: f32[8,8], index: 4, kind: input, shape index: {}]   ;;  %s1228_s5 = inlined_call_operand.vmem [shape: f32[8,1], index: 5, kind: input, shape index: {}]   ;;  %s1229_s6 = inlined_call_operand.vmem [shape: f32[8,1], index: 6, kind: input, shape index: {}]   ;;  %s1230_s7 = inlined_call_operand.hbm [shape: f32[2,8,384], index: 7, kind: output, shape index: {}]  }
   0x1   :  { %14 = vsyncpa [#allocation4 + $0x1], 0  ;;  %s1020_s24 = smov 0   ;;  %s1022_s25 = smov 0  }
   0x2   :  { %s1024_s26 = smov 0   ;;  %s1026_s27 = smov 0  }
   0x3 LB: > { %s1041_s28 = sadd.s32 4294967295, %s966_s27   ;;  %s825_s29 = sadd.s32 4294967294, %s966_s27   ;;  %s966_s27 = sphi %s1026_s27, %s1236_s27   ;;  %s962_s26 = sphi %s1024_s26, %s1235_s26   ;;  %s958_s25 = sphi %s1022_s25, %s1234_s25   ;;  %s954_s24 = sphi %s1020_s24, %s1233_s24  }
   0x4   : > { %s1045_s30 = sadd.s32 1, %s966_s27   ;;  %s179_s8 = sadd.s32 1, %s962_s26 }
   0x5   : > { %s176_s9 = ssub.s32 %s966_s27, %s1045_s30  ;;  %p189_p0 = scmp.ne.s32.totalorder %s962_s26, %s958_s25 }
   0x6   : > { %p177_p1 = scmp.eq.s32.totalorder %s176_s9, 0  ;;  %p190_p2 = scmp.eq.s32.totalorder %s1041_s28, 1 }
   0x7   : > { %p195_p3 = scmp.ne.s32.totalorder %s958_s25, %s954_s24  ;;  %p196_p4 = scmp.eq.s32.totalorder %s825_s29, 1 }
   0x8   : > { %s1056_s10 = scalar_select %p177_p1, %s962_s26, %s179_s8  }
   0x9   : > { %p1058_p5 = por %p190_p2, %p189_p0  ;;  %p1062_p6 = por %p196_p4, %p195_p3 }
   0xa   : > { %p828_p7 = scmp.ge.s32.totalorder %s966_s27, 1  ;;  %p240_p8 = scmp.lt.s32.totalorder %s966_s27, 3 }
   0xc   : > { %p241_p9 = pnand %p828_p7, %p240_p8 }
   0xd   : > { %p272_p10 = scmp.lt.s32.totalorder (!%p241_p9), %s1041_s28, 1  ;;  %s969_s9 = smov (!%p241_p9), 127  }
   0xe   : > { %244 = sbr.rel (%p241_p9) target bundleno = 544 (0x220), region = 48  ;;  %s970_s13 = smov (!%p241_p9), 126  }
   0xf   : > { %s971_s14 = smov (!%p241_p9), 110   ;;  %s972_s15 = smov (!%p241_p9), 109  }
  0x10   : > { %s973_s16 = smov (!%p241_p9), 108   ;;  %s974_s17 = smov (!%p241_p9), 92  }
  0x11   : > { %s975_s18 = smov (!%p241_p9), 91   ;;  %s976_s19 = smov (!%p241_p9), 90  }
  0x13   : > { %v833_v0 = vld [vmem:[%s1224_s1 + $0x18] sm:$0xff]  ;;  %v831_v1 = vld [vmem:[%s1224_s1 + $0x8] sm:$0xff]  ;;  %v968_v2 = vmov 0   ;;  %v834_v3 = vld [vmem:[%s1224_s1 + $0x20] sm:$0xff]  ;;  %s273_s21 = scalar_select %p272_p10, %s1041_s28, 1  ;;  %v977_v52 = vmov 0.0  }
  0x14   : > { %905 = vset.pattern.permute.xlu1 %v968_v2  ;;  %904 = vset.pattern.permute.xlu0 %v968_v2  ;;  %v832_v4 = vld [vmem:[%s1224_s1 + $0x10] sm:$0xff]  ;;  %v835_v6 = vld [vmem:[%s1224_s1 + $0x28] sm:$0xff]  ;;  %v838_v7 = vld [vmem:[%s1224_s1 + $0x40] sm:$0xff]  ;;  %vm978_vm0 = vmmov 0   ;;  %vm316_vm1 = vcmask 1039360   ;;  %vm349_vm2 = vcmask 1031168  }
  0x15   : > { %363 = vperm.xlu1 %905, %v833_v0   ;;  %297 = vperm.xlu0 %904, %v831_v1   ;;  %v836_v5 = vld [vmem:[%s1224_s1 + $0x30] sm:$0xff]  ;;  %v837_v8 = vld [vmem:[%s1224_s1 + $0x38] sm:$0xff]  ;;  %v566_v9 = vld [vmem:[%s1226_s3] sm:$0xff]  ;;  %s844_s22 = sshll.u32 %s273_s21, 5  ;;  %vm382_vm3 = vcmask 900096   ;;  %vm415_vm4 = vcmask 891904  }
  0x16   : > { %v281_v10 = vld [vmem:[%s1224_s1] sm:$0xff]  ;;  %s276_s8 = scalar_lea.vmem %s1223_s0, %s844_s22  ;;  %847 = vmatprep.subr.mxu1 %v977_v52  ;;  %653 = vmatprep.mubr.f32.mxu0 %v977_v52  ;;  %vm448_vm5 = vcmask 883712   ;;  %vm481_vm6 = vcmask 752640   ;;  %vm514_vm7 = vcmask 744448   ;;  %vm547_vm8 = vcmask 736256  }
  0x17   : > { %v557_v11 = vld [vmem:[%s1225_s2] sm:$0xff]  ;;  %v1106_v12 = vld [vmem:[%s276_s8 + $0x10] sm:$0xff]  ;;  %v1108_v13 = vld [vmem:[%s276_s8 + $0x8] sm:$0xff]  ;;  %849 = vmatprep.mubr.msk.f32.mxu1 %vm978_vm0, %v977_v52  ;;  %vm585_vm9 = vcmask 64512  }
  0x18   : > { %v1112_v17 = vld [vmem:[%s276_s8] sm:$0xff]  ;;  %v1116_v21 = vld [vmem:[%s276_s8 + $0x18] sm:$0xff] }
  0x19   : > { %396 = vperm.xlu1 %905, %v834_v3   ;;  %330 = vperm.xlu0 %904, %v832_v4   ;;  %v739_v57 = vld [vmem:[%s1229_s6] sm:$0xff] }
  0x1a   : > { %v730_v58 = vld [vmem:[%s1228_s5] sm:$0xff] }
  0x1d   : > { %462 = vperm.xlu1 %905, %v836_v5   ;;  %429 = vperm.xlu0 %904, %v835_v6  }
  0x21   : > { %528 = vperm.xlu1 %905, %v838_v7   ;;  %495 = vperm.xlu0 %904, %v837_v8  }
  0x25   : > { %569 = vperm.xlu1 %905, %v566_v9   ;;  %284 = vperm.xlu0 %904, %v281_v10  }
  0x29   : > { %560 = vperm.xlu0 %904, %v557_v11  }
  0x90   : > { %v298_v14 = vpop.permute.xlu0 %297  ;;  %v364_v24 = vpop.permute.xlu1 %363 }
  0x91   : > { %v302_v15 = vmul.f32 %v298_v14, %v1106_v12  ;;  %v301_v16 = vmul.f32 %v298_v14, %v1108_v13  ;;  %v300_v20 = vmul.f32 %v298_v14, %v1112_v17  ;;  %v303_v22 = vmul.f32 %v298_v14, %v1116_v21 }
  0x92   : > { %v367_v25 = vmul.f32 %v364_v24, %v1108_v13  ;;  %v368_v28 = vmul.f32 %v364_v24, %v1106_v12  ;;  %v366_v31 = vmul.f32 %v364_v24, %v1112_v17  ;;  %v369_v32 = vmul.f32 %v364_v24, %v1116_v21 }
  0x93   : > { %312 = vrot.lane.b32.xlu0 %v302_v15, %s969_s9  ;;  %310 = vrot.lane.b32.xlu1 %v301_v16, %s969_s9 }
  0x94   : > { %v331_v18 = vpop.permute.xlu0 %330  ;;  %v397_v29 = vpop.permute.xlu1 %396 }
  0x95   : > { %v334_v19 = vmul.f32 %v331_v18, %v1108_v13  ;;  %v335_v23 = vmul.f32 %v331_v18, %v1106_v12  ;;  %v333_v26 = vmul.f32 %v331_v18, %v1112_v17  ;;  %v336_v27 = vmul.f32 %v331_v18, %v1116_v21 }
  0x96   : > { %v400_v30 = vmul.f32 %v397_v29, %v1108_v13  ;;  %v401_v33 = vmul.f32 %v397_v29, %v1106_v12  ;;  %v399_v36 = vmul.f32 %v397_v29, %v1112_v17  ;;  %v402_v37 = vmul.f32 %v397_v29, %v1116_v21 }
  0x97   : > { %343 = vrot.lane.b32.xlu0 %v334_v19, %s970_s13  ;;  %308 = vrot.lane.b32.xlu1 %v300_v20, %s969_s9 }
  0x98   : > { %v430_v34 = vpop.permute.xlu0 %429  ;;  %v463_v39 = vpop.permute.xlu1 %462 }
  0x99   : > { %v433_v35 = vmul.f32 %v430_v34, %v1108_v13  ;;  %v434_v38 = vmul.f32 %v430_v34, %v1106_v12  ;;  %v466_v40 = vmul.f32 %v463_v39, %v1108_v13  ;;  %v432_v41 = vmul.f32 %v430_v34, %v1112_v17 }
  0x9a   : > { %v435_v42 = vmul.f32 %v430_v34, %v1116_v21  ;;  %v467_v43 = vmul.f32 %v463_v39, %v1106_v12  ;;  %v465_v46 = vmul.f32 %v463_v39, %v1112_v17  ;;  %v468_v51 = vmul.f32 %v463_v39, %v1116_v21 }
  0x9b   : > { %314 = vrot.lane.b32.xlu0 %v303_v22, %s969_s9  ;;  %345 = vrot.lane.b32.xlu1 %v335_v23, %s970_s13  ;;  %s269_s9 = sand.u32 1, %s958_s25  }
  0x9c   : > { %v496_v44 = vpop.permute.xlu0 %495  ;;  %v529_v49 = vpop.permute.xlu1 %528  ;;  %s752_s20 = scalar_lea.sflag [#allocation4], %s269_s9 }
  0x9d   : > { %v499_v45 = vmul.f32 %v496_v44, %v1108_v13  ;;  %v498_v47 = vmul.f32 %v496_v44, %v1112_v17  ;;  %v500_v48 = vmul.f32 %v496_v44, %v1106_v12  ;;  %v533_v50 = vmul.f32 %v529_v49, %v1106_v12 }
  0x9e   : > { %v501_v53 = vmul.f32 %v496_v44, %v1116_v21  ;;  %v532_v54 = vmul.f32 %v529_v49, %v1108_v13  ;;  %v534_v55 = vmul.f32 %v529_v49, %v1116_v21  ;;  %v531_v56 = vmul.f32 %v529_v49, %v1112_v17 }
  0x9f   : > { %376 = vrot.lane.b32.xlu0 %v367_v25, %s971_s14  ;;  %341 = vrot.lane.b32.xlu1 %v333_v26, %s970_s13 }
  0xa0   : > { %v285_v59 = vpop.permute.xlu0 %284  ;;  %v1152_v60 = vpop.permute.xlu1 %569 }
  0xa1   : > { %v288_v24 = vmul.f32 %v285_v59, %v1108_v13 }
  0xa3   : > { %347 = vrot.lane.b32.xlu0 %v336_v27, %s970_s13  ;;  %378 = vrot.lane.b32.xlu1 %v368_v28, %s971_s14  ;;  %s852_s13 = smul.u32 24, %s269_s9 }
  0xa4   : > { %v1154_v61 = vpop.permute.xlu0 %560 }
  0xa7   : > { %409 = vrot.lane.b32.xlu0 %v400_v30, %s972_s15  ;;  %374 = vrot.lane.b32.xlu1 %v366_v31, %s971_s14 }
  0xab   : > { %380 = vrot.lane.b32.xlu0 %v369_v32, %s971_s14  ;;  %411 = vrot.lane.b32.xlu1 %v401_v33, %s972_s15  ;;  %v287_v32 = vmul.f32 %v285_v59, %v1112_v17  ;;  %v289_v33 = vmul.f32 %v285_v59, %v1106_v12  ;;  %s853_s14 = smul.u32 384, %s1041_s28  ;;  %s979_s28 = smov [#allocation3]  }
  0xac   : > { %s910_s22 = sshll.u32 %s979_s28, 4  ;;  %s911_s22 = int_to_ptr.vmem [resolvable:$false] %s910_s22 }
  0xad   : > { %s912_s23 = scalar_lea.vmem %s911_s22, 768 }
  0xaf   : > { %442 = vrot.lane.b32.xlu0 %v433_v35, %s973_s16  ;;  %407 = vrot.lane.b32.xlu1 %v399_v36, %s972_s15 }
  0xb3   : > { %413 = vrot.lane.b32.xlu0 %v402_v37, %s972_s15  ;;  %444 = vrot.lane.b32.xlu1 %v434_v38, %s973_s16  ;;  %s271_s15 = scalar_lea.vmem [#allocation3], %s852_s13 }
  0xb7   : > { %475 = vrot.lane.b32.xlu0 %v466_v40, %s974_s17  ;;  %440 = vrot.lane.b32.xlu1 %v432_v41, %s973_s16 }
  0xbb   : > { %446 = vrot.lane.b32.xlu0 %v435_v42, %s973_s16  ;;  %477 = vrot.lane.b32.xlu1 %v467_v43, %s974_s17  ;;  %s766_s16 = sshll.u32 %s271_s15, 4  ;;  %s767_s16 = int_to_ptr.vmem [resolvable:$true] %s766_s16 }
  0xbc   : > { %s906_s21 = scalar_lea.vmem %s767_s16, 384  ;;  %p913_p0 = scmp.lt.s32.totalorder %s767_s16, %s911_s22 }
  0xbd   : > { %p907_p11 = scmp.ne.s32.totalorder %s767_s16, %s906_s21  ;;  %p914_p1 = scmp.lt.s32.totalorder %s912_s23, %s906_s21 }
  0xbf   : > { %508 = vrot.lane.b32.xlu0 %v499_v45, %s975_s18  ;;  %473 = vrot.lane.b32.xlu1 %v465_v46, %s974_s17  ;;  %p908_p12 = pnand %p907_p11, %p1058_p5  ;;  %p915_p2 = por %p914_p1, %p913_p0 }
  0xc1   : > { %p909_p13 = pneg %p908_p12 }
  0xc3   : > { %506 = vrot.lane.b32.xlu0 %v498_v47, %s975_s18  ;;  %510 = vrot.lane.b32.xlu1 %v500_v48, %s975_s18  ;;  %p916_p3 = pnand %p915_p2, %p909_p13 }
  0xc7   : > { %543 = vrot.lane.b32.xlu0 %v533_v50, %s976_s19  ;;  %479 = vrot.lane.b32.xlu1 %v468_v51, %s974_s17 }
  0xcb   : > { %512 = vrot.lane.b32.xlu0 %v501_v53, %s975_s18  ;;  %541 = vrot.lane.b32.xlu1 %v532_v54, %s976_s19 }
  0xcf   : > { %545 = vrot.lane.b32.xlu0 %v534_v55, %s976_s19  ;;  %539 = vrot.lane.b32.xlu1 %v531_v56, %s976_s19  ;;  %s764_s19 = scalar_lea.hbm %s1230_s7, %s853_s14 }
  0xd3   : > { %742 = vperm.xlu0 %904, %v739_v57   ;;  %733 = vperm.xlu1 %905, %v730_v58  }
 0x105   : > { %v313_v62 = vpop.permute.xlu0 %312  ;;  %v311_v63 = vpop.permute.xlu1 %310 }
 0x106   : > { %v318_v23 = vsel %vm316_vm1, %v311_v63, %v313_v62 }
 0x107   : > { %v324_v26 = vadd.f32 %v318_v23, %v288_v24 }
 0x109   : > { %v344_v0 = vpop.permute.xlu0 %343  ;;  %v309_v1 = vpop.permute.xlu1 %308 }
 0x10a   : > { %v317_v29 = vsel %vm316_vm1, %v309_v1, %v311_v63 }
 0x10b   : > { %v323_v37 = vadd.f32 %v317_v29, %v287_v32 }
 0x10d   : > { %v315_v2 = vpop.permute.xlu0 %314  ;;  %v346_v3 = vpop.permute.xlu1 %345 }
 0x10e   : > { %v351_v25 = vsel %vm349_vm2, %v344_v0, %v346_v3  ;;  %v319_v30 = vsel %vm316_vm1, %v313_v62, %v315_v2 }
 0x10f   : > { %v357_v34 = vadd.f32 %v351_v25, %v324_v26  ;;  %v325_v38 = vadd.f32 %v319_v30, %v289_v33 }
 0x111   : > { %v377_v4 = vpop.permute.xlu0 %376  ;;  %v342_v5 = vpop.permute.xlu1 %341 }
 0x112   : > { %v350_v35 = vsel %vm349_vm2, %v342_v5, %v344_v0 }
 0x113   : > { %v356_v43 = vadd.f32 %v350_v35, %v323_v37 }
 0x115   : > { %v348_v6 = vpop.permute.xlu0 %347  ;;  %v379_v7 = vpop.permute.xlu1 %378 }
 0x116   : > { %v384_v31 = vsel %vm382_vm3, %v377_v4, %v379_v7  ;;  %v352_v13 = vsel %vm349_vm2, %v346_v3, %v348_v6 }
 0x117   : > { %v390_v39 = vadd.f32 %v384_v31, %v357_v34  ;;  %v358_v44 = vadd.f32 %v352_v13, %v325_v38  ;;  %v581_v31 = vld [vmem:[%s1227_s4] sm:$0xff] }
 0x119   : > { %v410_v8 = vpop.permute.xlu0 %409  ;;  %v375_v9 = vpop.permute.xlu1 %374 }
 0x11a   : > { %v383_v42 = vsel %vm382_vm3, %v375_v9, %v377_v4 }
 0x11b   : > { %v389_v49 = vadd.f32 %v383_v42, %v356_v43 }
 0x11d   : > { %v381_v10 = vpop.permute.xlu0 %380  ;;  %v412_v11 = vpop.permute.xlu1 %411 }
 0x11e   : > { %v417_v36 = vsel %vm415_vm4, %v410_v8, %v412_v11  ;;  %v385_v17 = vsel %vm382_vm3, %v379_v7, %v381_v10 }
 0x11f   : > { %v423_v45 = vadd.f32 %v417_v36, %v390_v39  ;;  %v391_v50 = vadd.f32 %v385_v17, %v358_v44 }
 0x121   : > { %v443_v14 = vpop.permute.xlu0 %442  ;;  %v408_v15 = vpop.permute.xlu1 %407 }
 0x122   : > { %v416_v46 = vsel %vm415_vm4, %v408_v15, %v410_v8 }
 0x123   : > { %v422_v57 = vadd.f32 %v416_v46, %v389_v49 }
 0x125   : > { %v414_v16 = vpop.permute.xlu0 %413  ;;  %v445_v18 = vpop.permute.xlu1 %444 }
 0x126   : > { %v450_v12 = vsel %vm448_vm5, %v443_v14, %v445_v18  ;;  %v418_v47 = vsel %vm415_vm4, %v412_v11, %v414_v16 }
 0x127   : > { %v456_v51 = vadd.f32 %v450_v12, %v423_v45  ;;  %v424_v58 = vadd.f32 %v418_v47, %v391_v50 }
 0x129   : > { %v476_v19 = vpop.permute.xlu0 %475  ;;  %v441_v20 = vpop.permute.xlu1 %440 }
 0x12a   : > { %v449_v54 = vsel %vm448_vm5, %v441_v20, %v443_v14 }
 0x12b   : > { %v455_v0 = vadd.f32 %v449_v54, %v422_v57 }
 0x12d   : > { %v447_v21 = vpop.permute.xlu0 %446  ;;  %v478_v22 = vpop.permute.xlu1 %477 }
 0x12e   : > { %v483_v48 = vsel %vm481_vm6, %v476_v19, %v478_v22  ;;  %v451_v55 = vsel %vm448_vm5, %v445_v18, %v447_v21 }
 0x12f   : > { %v489_v59 = vadd.f32 %v483_v48, %v456_v51  ;;  %v457_v1 = vadd.f32 %v451_v55, %v424_v58 }
 0x131   : > { %v509_v27 = vpop.permute.xlu0 %508  ;;  %v474_v28 = vpop.permute.xlu1 %473 }
 0x132   : > { %v482_v62 = vsel %vm481_vm6, %v474_v28, %v476_v19 }
 0x133   : > { %v488_v8 = vadd.f32 %v482_v62, %v455_v0 }
 0x135   : > { %v507_v40 = vpop.permute.xlu0 %506  ;;  %v511_v41 = vpop.permute.xlu1 %510 }
 0x136   : > { %v516_v56 = vsel %vm514_vm7, %v509_v27, %v511_v41  ;;  %v515_v5 = vsel %vm514_vm7, %v507_v40, %v509_v27 }
 0x137   : > { %v522_v2 = vadd.f32 %v516_v56, %v489_v59  ;;  %v521_v11 = vadd.f32 %v515_v5, %v488_v8 }
 0x139   : > { %v544_v52 = vpop.permute.xlu0 %543  ;;  %v480_v53 = vpop.permute.xlu1 %479 }
 0x13a   : > { %v484_v63 = vsel %vm481_vm6, %v478_v22, %v480_v53 }
 0x13b   : > { %v490_v9 = vadd.f32 %v484_v63, %v457_v1 }
 0x13d   : > { %v513_v3 = vpop.permute.xlu0 %512  ;;  %v542_v4 = vpop.permute.xlu1 %541 }
 0x13e   : > { %v517_v6 = vsel %vm514_vm7, %v511_v41, %v513_v3  ;;  %v549_v7 = vsel %vm547_vm8, %v542_v4, %v544_v52 }
 0x13f   : > { %v555_v10 = vadd.f32 %v549_v7, %v522_v2  ;;  %v523_v14 = vadd.f32 %v517_v6, %v490_v9 }
 0x141   : > { %v546_v15 = vpop.permute.xlu0 %545  ;;  %v540_v16 = vpop.permute.xlu1 %539  ;;  %v564_v18 = vmul.f32 %v1154_v61, %v555_v10 }
 0x142   : > { %v550_v19 = vsel %vm547_vm8, %v544_v52, %v546_v15  ;;  %v548_v20 = vsel %vm547_vm8, %v540_v16, %v542_v4 }
 0x143   : > { %v556_v21 = vadd.f32 %v550_v19, %v523_v14  ;;  %v554_v22 = vadd.f32 %v548_v20, %v521_v11  ;;  %v573_v23 = vadd.f32 %v1152_v60, %v564_v18 }
 0x145   : > { %v576_v24 = vmax.f32 %v573_v23, 0.0  ;;  %v563_v25 = vmul.f32 %v1154_v61, %v554_v22  ;;  %v565_v26 = vmul.f32 %v1154_v61, %v556_v21 }
 0x147   : > { %619 = vmatprep.subr.mxu0 %v576_v24  ;;  %v572_v27 = vadd.f32 %v1152_v60, %v563_v25  ;;  %v574_v28 = vadd.f32 %v1152_v60, %v565_v26 }
 0x149   : > { %v575_v29 = vmax.f32 %v572_v27, 0.0  ;;  %v577_v30 = vmax.f32 %v574_v28, 0.0 }
 0x14b   : > { %620 = vmatpush1.msra.mxu0 %v575_v29  ;;  %848 = vmatpush3.msra.mxu1 %v577_v30 }
 0x14c   : > { %839 = vmatmul.mubr.msk.f32.vlgmr.msra.gmra.mxu0 %vm585_vm9, %v581_v31  ;;  %850 = vmatmul.mubr.msk.f32.vlgmr.msra.gmra.mxu1 %vm585_vm9, %v581_v31 }
 0x14e   : > { %v734_v61 = vpop.permute.xlu1 %733  ;;  %v743_v34 = vpop.permute.xlu0 %742 }
 0x20c   : > { %v655_v32 = vpop.f32.mrf.mxu0  ;;  %v726_v33 = vpop.f32.mrf.mxu1 }
 0x20d   : > { %v736_v35 = vmul.f32 %v734_v61, %v655_v32  ;;  %v738_v60 = vmul.f32 %v734_v61, %v726_v33 }
 0x20e   : > { %v657_v13 = vpop.f32.mrf.mxu0  ;;  %v851_v36 = vpop.f32.mrf.mxu1 }
 0x20f   : > { %v745_v37 = vadd.f32 %v743_v34, %v736_v35  ;;  %v747_v38 = vadd.f32 %v743_v34, %v738_v60  ;;  %v737_v39 = vmul.f32 %v734_v61, %v657_v13 }
 0x211   : > { %748 = vst [vmem:[%s271_s15] sm:$0xff] %v745_v37  ;;  %750 = vst [vmem:[%s271_s15 + $0x10] sm:$0xff] %v747_v38  ;;  %v746_v40 = vadd.f32 %v743_v34, %v737_v39 }
 0x213   : > { %749 = vst [vmem:[%s271_s15 + $0x8] sm:$0xff] %v746_v40 }
 0x214   : > { %919 = shalt.err (!%p916_p3)
}
 0x215   : > { %s920_s29 = scalar_lea.hbm %s764_s19, 384  ;;  %s924_s13 = scalar_lea.hbm %s1230_s7, 768 }
 0x216   : > { %p921_p4 = scmp.ne.s32.totalorder %s764_s19, %s920_s29  ;;  %p925_p9 = scmp.lt.s32.totalorder %s764_s19, %s1230_s7 }
 0x217   : > { %p926_p10 = scmp.lt.s32.totalorder %s924_s13, %s920_s29 }
 0x218   : > { %p922_p7 = pnand %p921_p4, %p1058_p5 }
 0x219   : > { %p927_p11 = por %p926_p10, %p925_p9 }
 0x21a   : > { %p923_p8 = pneg %p922_p7 }
 0x21c   : > { %p928_p12 = pnand %p927_p11, %p923_p8 }
 0x21e   : > { %931 = shalt.err (!%p928_p12)
}
 0x21f   : > { %854 = dma.vmem_to_hbm [thread:$0]  (%p1058_p5), %s767_s16, 384, %s764_s19, %s752_s20  }
 0x220 PF: > { %p860_p13 = scmp.ge.s32.totalorder %s966_s27, 2  ;;  %s778_s17 = sand.u32 1, %s954_s24  }
 0x221   : > { %s779_s18 = scalar_lea.sflag [#allocation4], %s778_s17 }
 0x222   : > { %p857_p0 = pnand %p860_p13, %p1062_p6 }
 0x224   : > { %p858_p1 = pneg %p857_p0 }
 0x226   : > { %949 = dma.done.wait (%p858_p1), %s779_s18, 384  }
 0x227   : > { %951 = vsyncadd (%p858_p1), %s779_s18, 4294966912  ;;  %p17_p2 = scmp.ge.s32.totalorder %s1045_s30, 4   ;;  %s1233_s24 = smov %s958_s25 }
 0x228   : > { %s1234_s25 = smov %s962_s26  ;;  %s1235_s26 = smov %s1056_s10 }
 0x229   : > { %s1236_s27 = smov %s1045_s30  ;;  %19 = sbr.rel (!%p17_p2) target bundleno = 3 (0x3), region = 91 }
 0x22e   :  { %784 = vsyncpa [#allocation4], 1 }
 0x22f   :  { %786 = vsyncpa [#allocation4 + $0x1], 1 }

</bundles_post_ra>
